<compile_context>
chip_gen: v6e
topology: v6e:2x2x1
jax: 0.10.0
libtpu: 0.0.40
codegen_flags: <defaults>
</compile_context>

<pallas_src>
import functools

import jax
import jax.numpy as jnp
from jax.experimental import pallas as pl
from jax.experimental.pallas import tpu as pltpu


def _round_up(n, m):
    return ((n + m - 1) // m) * m


def _entropy_rows_kernel(x_ref, o_ref, *, tb, total_rows):
    """Writes per-row sum_c p*logp (0 for padded rows) to o_ref: (tb, 1)."""
    i = pl.program_id(0)

    x = x_ref[...].astype(jnp.float32)                       # (tb, C)

    # Numerically-stable entropy:  sum_c p*logp = (sum_c e*s)/z - log(z)
    m = jnp.max(x, axis=-1, keepdims=True)                   # (tb, 1)
    s = x - m
    e = jnp.exp(s)                                           # EUP
    z = jnp.sum(e, axis=-1, keepdims=True)                   # (tb, 1)
    es = jnp.sum(e * s, axis=-1, keepdims=True)              # (tb, 1)
    row = es / z - jnp.log(z)                                # (tb, 1), per-row only

    # Mask rows beyond the true batch (ragged last tile reads garbage).
    row_ids = i * tb + jax.lax.broadcasted_iota(jnp.int32, (tb, 1), 0)
    o_ref[...] = jnp.where(row_ids < total_rows, row, 0.0)


def _pick_tb(B, C, itemsize):
    """Batch-tile rows: ~4 MiB of input per grid step, multiple of 8."""
    target_bytes = 4 * 1024 * 1024
    tb = max(8, (target_bytes // max(1, C * itemsize)) // 8 * 8)
    tb = min(tb, _round_up(B, 8))
    return max(8, tb)


def entropy_loss(x, *, tb=None):
    """Pallas TPU implementation of EntropyLoss.forward for 2-D input (B, C).

    Accepts f32 or bf16 logits; math is done in f32 inside the kernel.
    """
    B, C = x.shape
    itemsize = jnp.dtype(x.dtype).itemsize
    if tb is None:
        tb = _pick_tb(B, C, itemsize)
    else:
        tb = max(8, (int(tb) // 8) * 8)
        tb = min(tb, _round_up(B, 8))

    num_tiles = pl.cdiv(B, tb)
    kernel = functools.partial(_entropy_rows_kernel, tb=tb, total_rows=B)

    rows = pl.pallas_call(
        kernel,
        out_shape=jax.ShapeDtypeStruct((B, 1), jnp.float32),
        grid_spec=pltpu.PrefetchScalarGridSpec(
            num_scalar_prefetch=0,
            grid=(num_tiles,),
            in_specs=[pl.BlockSpec((tb, C), lambda i: (i, 0))],
            out_specs=pl.BlockSpec((tb, 1), lambda i: (i, 0)),
        ),
        compiler_params=pltpu.CompilerParams(
            # Each step writes an independent output block -> fully parallel
            # (lets v7x's two TensorCores both stream HBM).
            dimension_semantics=("parallel",),
            vmem_limit_bytes=64 * 1024 * 1024,
        ),
        cost_estimate=pl.CostEstimate(
            flops=4 * B * C,
            transcendentals=B * C,
            bytes_accessed=B * C * itemsize + B * 4,
        ),
    )(x)

    # Tiny final reduction + mean in JAX (keeps the grid axis parallel).
    return -jnp.sum(rows) / jnp.float32(B)


def entropy_loss_ref(x):
    """Pure-JAX reference matching torch semantics."""
    xf = x.astype(jnp.float32)
    logp = jax.nn.log_softmax(xf, axis=1)
    p = jax.nn.softmax(xf, axis=1)
    return -1.0 * jnp.mean(jnp.sum(p * logp, axis=-1))


if __name__ == "__main__":
    key = jax.random.PRNGKey(0)

    # Small logits matching the module's typical 2-D usage: batch=8, classes=32.
    B, C = 8, 32
    x = jax.random.normal(key, (B, C), dtype=jnp.float32)

    out = entropy_loss(x)
    out = jax.block_until_ready(out)
    ref = entropy_loss_ref(x)
    assert jnp.allclose(out, ref, atol=1e-5, rtol=1e-5), (out, ref)

    # Ragged batch (exercises the masking path; tb rounds up to 16 > B2=10).
    B2 = 10
    x2 = jax.random.normal(jax.random.PRNGKey(1), (B2, C), dtype=jnp.float32)
    out2 = jax.block_until_ready(entropy_loss(x2))
    ref2 = entropy_loss_ref(x2)
    assert jnp.allclose(out2, ref2, atol=1e-5, rtol=1e-5), (out2, ref2)

    # bf16 logits in HBM, f32 math in-kernel.
    x3 = x.astype(jnp.bfloat16)
    out3 = jax.block_until_ready(entropy_loss(x3))
    ref3 = entropy_loss_ref(x3)
    assert jnp.allclose(out3, ref3, atol=1e-2, rtol=1e-2), (out3, ref3)

    print("KERNEL_OK")
</pallas_src>

<mosaic_0001>
module attributes {stable_mosaic.version = 11 : i64} {
  func.func @_entropy_rows_kernel(%arg0: i32, %arg1: memref<8x32xf32, #tpu.memory_space<vmem>>, %arg2: memref<8x1xf32, #tpu.memory_space<vmem>>) attributes {dimension_semantics = [#tpu.dimension_semantics<parallel>], iteration_bounds = array<i64: 1>, scalar_prefetch = 0 : i64, scratch_operands = 0 : i64, tpu.core_type = #tpu.core_type<tc>, window_params = [{transform_indices = @transform_0, window_bounds = array<i64: 8, 32>}, {transform_indices = @transform_1, window_bounds = array<i64: 8, 1>}]} {
    %c0 = arith.constant 0 : index
    %c0_0 = arith.constant 0 : index
    %0 = vector.load %arg1[%c0, %c0_0] : memref<8x32xf32, #tpu.memory_space<vmem>>, vector<8x32xf32>
    %cst = arith.constant dense<0xFF800000> : vector<8xf32>
    %1 = vector.multi_reduction <maximumf>, %0, %cst [1] : vector<8x32xf32> to vector<8xf32>
    %2 = vector.shape_cast %1 : vector<8xf32> to vector<8x1xf32>
    %3 = vector.broadcast %2 : vector<8x1xf32> to vector<8x32xf32>
    %4 = arith.subf %0, %3 : vector<8x32xf32>
    %5 = math.exp %4 : vector<8x32xf32>
    %cst_1 = arith.constant dense<0.000000e+00> : vector<8xf32>
    %6 = vector.multi_reduction <add>, %5, %cst_1 [1] : vector<8x32xf32> to vector<8xf32>
    %7 = vector.shape_cast %6 : vector<8xf32> to vector<8x1xf32>
    %8 = arith.mulf %5, %4 : vector<8x32xf32>
    %cst_2 = arith.constant dense<0.000000e+00> : vector<8xf32>
    %9 = vector.multi_reduction <add>, %8, %cst_2 [1] : vector<8x32xf32> to vector<8xf32>
    %10 = vector.shape_cast %9 : vector<8xf32> to vector<8x1xf32>
    %11 = arith.divf %10, %7 : vector<8x1xf32>
    %12 = math.log %7 : vector<8x1xf32>
    %13 = arith.subf %11, %12 : vector<8x1xf32>
    %c8_i32 = arith.constant 8 : i32
    %14 = arith.muli %arg0, %c8_i32 : i32
    %15 = tpu.iota {dimensions = array<i32: 0>} : vector<8x1xi32>
    %16 = vector.broadcast %14 : i32 to vector<8x1xi32>
    %17 = arith.addi %16, %15 : vector<8x1xi32>
    %c8_i32_3 = arith.constant 8 : i32
    %18 = vector.broadcast %c8_i32_3 : i32 to vector<8x1xi32>
    %19 = arith.cmpi slt, %17, %18 : vector<8x1xi32>
    %cst_4 = arith.constant 0.000000e+00 : f32
    %20 = vector.broadcast %cst_4 : f32 to vector<8x1xf32>
    %21 = arith.select %19, %13, %20 : vector<8x1xi1>, vector<8x1xf32>
    %c0_5 = arith.constant 0 : index
    %c0_6 = arith.constant 0 : index
    %22 = vector.load %arg2[%c0_5, %c0_6] : memref<8x1xf32, #tpu.memory_space<vmem>>, vector<8x1xf32>
    tpu.vector_store %arg2[%c0_5, %c0_6], %21 {strides = array<i32>} : memref<8x1xf32, #tpu.memory_space<vmem>>, vector<8x1xf32>,
    return
  }
  func.func @transform_0(%arg0: i32) -> (i32, i32) {
    %c0_i32 = arith.constant 0 : i32
    %c0_i32_0 = arith.constant 0 : i32
    return %arg0, %c0_i32 : i32, i32
  }
  func.func @transform_1(%arg0: i32) -> (i32, i32) {
    %c0_i32 = arith.constant 0 : i32
    %c0_i32_0 = arith.constant 0 : i32
    return %arg0, %c0_i32 : i32, i32
  }
}

</mosaic_0001>

<bundles_post_ra>
// kernel: tpu_custom_call.1
= control target key start
LH: loop header
LB: loop body
LE: loop exit
PB: predicated region body
PF: predicated region fallthrough
CT: control target
= control target key end

     0   :  { %6 = vsyncpa [#allocation3], 0  ;;  %s83_s6 = smov [#allocation2]   ;;  %s100_s0 = inlined_call_operand.hbm [shape: f32[8,32], index: 0, kind: input, shape index: {}]   ;;  %s101_s1 = inlined_call_operand.vmem [shape: f32[8,1], index: 1, kind: output, shape index: {}]  }
   0x1   :  { %s13_s7 = sshll.u32 %s83_s6, 4  ;;  %s14_s7 = int_to_ptr.vmem [resolvable:$true] %s13_s7 }
   0x2   :  { %s69_s8 = scalar_lea.vmem %s14_s7, 128  ;;  %p74_p1 = scmp.lt.s32.totalorder %s14_s7, %s14_s7 }
   0x3   :  { %p70_p0 = scmp.ne.s32.totalorder %s14_s7, %s69_s8  ;;  %p75_p2 = scmp.lt.s32.totalorder %s69_s8, %s69_s8 }
   0x5   :  { %p76_p3 = por %p75_p2, %p74_p1 }
   0x7   :  { %p77_p4 = pnand %p76_p3, %p70_p0 }
   0x9   :  { %80 = shalt.err (!%p77_p4)
}
   0xa   :  { %16 = dma.hbm_to_vmem [thread:$0]  %s100_s0, 128, %s14_s7, [#allocation3]  }
   0xb   :  { %81 = dma.done.wait [#allocation3], 128  }
   0xc   :  { %82 = vsyncadd [#allocation3], 4294967168  ;;  %vm21_vm0 = vcmask 261120   ;;  %v20_v0 = vld [vmem:[#allocation2] sm:$0xff]  ;;  %vm47_vm1 = vcmask 7168  }
   0xd   :  { %v22_v1 = vsel %vm21_vm0, %v20_v0, -inf }
   0xe   :  { %23 = vmax.xlane.f32.xlu0 %v22_v1 }
  0x97   :  { %v24_v2 = vpop.xlane.xlu0 %23 }
  0x98   :  { %v25_v3 = vsub.f32 %v20_v0, %v24_v2 }
  0x9a   :  { %v26_v4 = vmul.f32 1.442695, %v25_v3 }
  0x9c   :  { %55 = vpow2.f32 %v26_v4 }
  0xa9   :  { %v56_v5 = vpop.eup %55 }
  0xaa   :  { %v28_v6 = vsel %vm21_vm0, %v56_v5, 0.0  ;;  %v31_v7 = vmul.f32 %v56_v5, %v25_v3 }
  0xab   :  { %29 = vadd.xlane.f32.xlu0 %v28_v6 }
  0xac   :  { %v32_v8 = vsel %vm21_vm0, %v31_v7, 0.0 }
  0xad   :  { %33 = vadd.xlane.f32.xlu1 %v32_v8 }
 0x134   :  { %v30_v9 = vpop.xlane.xlu0 %29 }
 0x135   :  { %57 = vrcp.f32 %v30_v9 }
 0x136   :  { %59 = vlog2.f32 %v30_v9  ;;  %v34_v11 = vpop.xlane.xlu1 %33 }
 0x142   :  { %v58_v10 = vpop.eup %57 }
 0x143   :  { %v60_v12 = vpop.eup %59  ;;  %v36_v13 = vmul.f32 %v58_v10, %v34_v11 }
 0x144   :  { %v38_v14 = vmul.f32 0.6931472, %v60_v12 }
 0x146   :  { %v39_v15 = vsub.f32 %v36_v13, %v38_v14 }
 0x148   :  { %48 = vst.msk [vmem:[%s101_s1] sm:$0xff] %vm47_vm1, %v39_v15 }
 0x149   :  { %53 = vsyncpa [#allocation3], 1 }

</bundles_post_ra>
